<compile_context>
chip_gen: v6e
topology: v6e:2x2x1
jax: 0.10.0
libtpu: 0.0.40
codegen_flags: <defaults>
</compile_context>

<pallas_src>
import math

import jax
import jax.numpy as jnp
from jax.experimental import pallas as pl
from jax.experimental.pallas import tpu as pltpu

# ---- small, deterministic hyper-parameters consistent with MacGNN.__init__ ----
FIELD_DIMS = (50, 60, 20)   # (num users, num items, num cates); cate_embed unused in fwd
U_GROUP_ARG = 11            # constructor u_group_num
I_GROUP_ARG = 15            # constructor i_group_num
U = U_GROUP_ARG + 1         # self.u_group_num = 12
I = I_GROUP_ARG + 1         # self.i_group_num = 16
D = 8                       # embed_dim
H = 2 * D                   # aggregator hidden_dim
R = 10                      # recent_len
TAU = 0.8
B_BLK = 8                   # rows per request (Dice statistics are per-request)
NUM_REQ = 4                 # independent requests stacked along the grid axis
TOTAL_COLS = 2 + 2 * I + 2 * U + 2 * R   # = 78

FEAT_W = 2 * D + 2 * R * D               # 176 float-feature lanes (emb_u|emb_i|u_rec|i_rec)
WIDE_W = FEAT_W + 2 * I + 2 * U          # 232 = 176 + 56 count/probability lanes
# probability segments inside the packed lane layout (cnt order: u1|u2|i1|i2)
SEGMENTS = (
    (FEAT_W, FEAT_W + I),
    (FEAT_W + I, FEAT_W + I + U),
    (FEAT_W + I + U, FEAT_W + I + 2 * U),
    (FEAT_W + I + 2 * U, WIDE_W),
)


# --------------------------------------------------------------------------- #
# Pallas kernel: in-place group softmax + fused 3-layer MLP with Dice
# --------------------------------------------------------------------------- #
def _macgnn_kernel(xf_ref, w1f_ref, w2t_ref, slab_ref, out_ref):
    f32 = jnp.float32
    bf16 = jnp.bfloat16

    xf = xf_ref[...]                                          # [B_BLK, 232] f32
    lane = jax.lax.broadcasted_iota(jnp.int32, xf.shape, 1)   # lane index per column
    cnt_mask = lane >= FEAT_W                                 # count/probability lanes

    # ---- group softmax computed in the native packed lane layout.
    # Max-subtraction dropped: counts are >= 0, so exp(log(c+1)/tau) = (c+1)^1.25
    # cannot overflow f32.  Non-count lanes see c=0 -> e=1 (masked out below).
    c = jnp.where(cnt_mask, xf, 0.0)
    e = jnp.exp(jnp.log(c + 1.0) * (1.0 / TAU))
    denom = jnp.ones_like(e)
    for lo, hi in SEGMENTS:
        m = (lane >= lo) & (lane < hi)
        s = jnp.sum(jnp.where(m, e, 0.0), axis=1, keepdims=True)
        denom = jnp.where(m, s, denom)
    probs = e * pl.reciprocal(denom, approx=True)             # EUP slot, no divide

    # `wide` is the folded-MLP input, built with a single lane select: float
    # features keep their lanes, count lanes become their softmax probabilities.
    wide = jnp.where(cnt_mask, probs, xf)                     # [B_BLK, 232]

    # ---- small-parameter slab: biases, last-layer weight row, Dice alphas
    slab = slab_ref[...]                                      # [4, 256] f32
    b1 = slab[0:1, 0:200]
    b2 = slab[1:2, 0:80]
    w3 = slab[2:3, 0:80]
    b3 = slab[3:4, 0:1]
    a1 = slab[3:4, 1:2]
    a2 = slab[3:4, 2:3]

    def dice(h, alpha):
        # One-pass variance: the two axis=0 reductions are independent.
        n = h.shape[0]
        s1 = jnp.sum(h, axis=0, keepdims=True)
        s2 = jnp.sum(h * h, axis=0, keepdims=True)
        mean = s1 * (1.0 / n)
        var = (s2 - n * mean * mean) * (1.0 / (n - 1))        # torch.std ddof=1
        # No epsilon, to match the PyTorch /std behavior (zero batch variance
        # would produce inf/NaN in both implementations).
        norm = (h - mean) * jax.lax.rsqrt(var)
        p = jax.nn.sigmoid(norm + 1e-8)
        return h * p + alpha * h * (1.0 - p)

    # ---- fused MLP.  The V-projections and recent-history pooling are folded
    # into w1f (done once at init); both matmuls run as single-pass bf16 on the
    # MXU with f32 accumulation.
    h1 = jnp.dot(wide.astype(bf16), w1f_ref[...], preferred_element_type=f32) + b1   # [B, 200]
    h1 = dice(h1, a1)
    h2 = jnp.dot(h1.astype(bf16), w2t_ref[...], preferred_element_type=f32) + b2     # [B, 80]
    h2 = dice(h2, a2)
    logit = jnp.sum(h2 * w3, axis=1, keepdims=True) + b3                              # [B, 1]
    out_ref[...] = jax.nn.sigmoid(logit)


# --------------------------------------------------------------------------- #
# Parameter folding (done once; batch independent)
# --------------------------------------------------------------------------- #
def fold_params(params):
    hp = jax.lax.Precision.HIGHEST
    w1t = params["mlp_w1"].T                       # [112, 200] (14*D rows)
    vwu_t = params["u_agg_Vw"].T                   # [D, 2D]
    vwi_t = params["i_agg_Vw"].T                   # [D, 2D]
    tv_u = jnp.dot(params["u_macro_embed"], vwu_t, precision=hp)   # [U, 2D]
    tv_i = jnp.dot(params["i_macro_embed"], vwi_t, precision=hp)   # [I, 2D]

    # PyTorch concated layout (14*D rows of w1t):
    # user_emb | u1_ws | u2_ws | u_rec_ws | item_emb | i1_ws | i2_ws | i_rec_ws
    blk_uemb = w1t[0:D]                                                          # [D, 200]
    blk_pu1 = jnp.dot(tv_i, w1t[D:3 * D], precision=hp)                          # [I, 200]
    blk_pu2 = jnp.dot(tv_u, w1t[3 * D:5 * D], precision=hp)                      # [U, 200]
    blk_urec = jnp.tile(jnp.dot(vwi_t, w1t[5 * D:7 * D], precision=hp), (R, 1))  # [R*D, 200]
    blk_iemb = w1t[7 * D:8 * D]                                                  # [D, 200]
    blk_pi1 = jnp.dot(tv_u, w1t[8 * D:10 * D], precision=hp)                     # [U, 200]
    blk_pi2 = jnp.dot(tv_i, w1t[10 * D:12 * D], precision=hp)                    # [I, 200]
    blk_irec = jnp.tile(jnp.dot(vwu_t, w1t[12 * D:14 * D], precision=hp), (R, 1))  # [R*D, 200]

    # Row order matches the in-kernel packed lane layout (float features first,
    # then probability segments in cnt order) -> no lane concatenation in-kernel.
    w1f = jnp.concatenate(
        [blk_uemb, blk_iemb, blk_urec, blk_irec, blk_pu1, blk_pu2, blk_pi1, blk_pi2],
        axis=0)
    assert w1f.shape == (WIDE_W, 200)

    slab = jnp.zeros((4, 256), jnp.float32)
    slab = slab.at[0, :200].set(params["mlp_b1"])
    slab = slab.at[1, :80].set(params["mlp_b2"])
    slab = slab.at[2, :80].set(params["mlp_w3"][0])
    slab = slab.at[3, 0].set(params["mlp_b3"][0])
    slab = slab.at[3, 1].set(params["alpha1"][0])
    slab = slab.at[3, 2].set(params["alpha2"][0])

    # bf16 weights -> single-pass MXU matmuls + half the weight DMA bytes.
    return {"w1f": w1f.astype(jnp.bfloat16),
            "w2t": params["mlp_w2"].T.astype(jnp.bfloat16),
            "slab": slab}


# --------------------------------------------------------------------------- #
# Wrapper (slicing + embedding gathers + input packing in plain JAX)
# --------------------------------------------------------------------------- #
def _split_x(x):
    user_id = x[:, 0]
    user_1ord = x[:, 1:I + 1]
    user_2ord = x[:, I + 1:I + U + 1]
    user_recent = x[:, I + U + 1:I + U + R + 1]
    item_id = x[:, I + U + R + 1]
    item_1ord = x[:, I + U + R + 2:I + 2 * U + R + 2]
    item_2ord = x[:, I + 2 * U + R + 2:2 * I + 2 * U + R + 2]
    item_recent = x[:, 2 * I + 2 * U + R + 2:]
    return (user_id, user_1ord, user_2ord, user_recent,
            item_id, item_1ord, item_2ord, item_recent)


def macgnn_forward(x, params, folded):
    """x: [num_req * B_BLK, 78]; each contiguous B_BLK-row block is an
    independent request (Dice statistics stay per 8-row request)."""
    (user_id, user_1ord, user_2ord, user_recent,
     item_id, item_1ord, item_2ord, item_recent) = _split_x(x)
    n = x.shape[0]
    assert n % B_BLK == 0
    num_req = n // B_BLK

    user_emb = params["user_embed"][user_id]                               # [N, D]
    item_emb = params["item_embed"][item_id]                               # [N, D]
    u_mask = jnp.repeat((user_recent > 0).astype(jnp.float32), D, axis=1)  # [N, R*D]
    i_mask = jnp.repeat((item_recent > 0).astype(jnp.float32), D, axis=1)  # [N, R*D]
    u_rec = params["item_embed"][user_recent].reshape(n, R * D) * u_mask   # pre-masked
    i_rec = params["user_embed"][item_recent].reshape(n, R * D) * i_mask
    cnt = jnp.concatenate([user_1ord, user_2ord, item_1ord, item_2ord],
                          axis=1).astype(jnp.float32)                      # exact small ints

    # single packed f32 slab: emb_u | emb_i | u_rec | i_rec | counts  -> [N, 232]
    xf = jnp.concatenate([user_emb, item_emb, u_rec, i_rec, cnt], axis=1)
    assert xf.shape[1] == WIDE_W

    out = pl.pallas_call(
        _macgnn_kernel,
        out_shape=jax.ShapeDtypeStruct((n, 1), jnp.float32),
        grid=(num_req,),
        in_specs=[
            pl.BlockSpec((B_BLK, WIDE_W), lambda g: (g, 0)),   # per-request activations
            pl.BlockSpec((WIDE_W, 200), lambda g: (0, 0)),     # weights: constant index_map
            pl.BlockSpec((200, 80), lambda g: (0, 0)),         #   -> VMEM-resident, fetched once
            pl.BlockSpec((4, 256), lambda g: (0, 0)),
        ],
        out_specs=pl.BlockSpec((B_BLK, 1), lambda g: (g, 0)),
        compiler_params=pltpu.CompilerParams(
            dimension_semantics=("parallel",)),                # both TCs on v7x
    )(xf, folded["w1f"], folded["w2t"], folded["slab"])
    return out


# --------------------------------------------------------------------------- #
# Deterministic parameter initialization (shapes from MacGNN.__init__)
# --------------------------------------------------------------------------- #
def init_params(key):
    ks = iter(jax.random.split(key, 24))

    def xavier(shape):
        bound = math.sqrt(6.0 / (shape[0] + shape[1]))
        return jax.random.uniform(next(ks), shape, jnp.float32, -bound, bound)

    def linear_w(out_f, in_f):
        bound = 1.0 / math.sqrt(in_f)
        return jax.random.uniform(next(ks), (out_f, in_f), jnp.float32, -bound, bound)

    def linear_b(out_f, in_f):
        bound = 1.0 / math.sqrt(in_f)
        return jax.random.uniform(next(ks), (out_f,), jnp.float32, -bound, bound)

    return {
        "user_embed": xavier((FIELD_DIMS[0], D)),
        "item_embed": xavier((FIELD_DIMS[1], D)),
        "cate_embed": xavier((FIELD_DIMS[2], D)),   # defined but unused in forward (as in PyTorch)
        "u_macro_embed": xavier((U, D)),
        "i_macro_embed": xavier((I, D)),
        # NeighborAggregation linear weights (bias=False), PyTorch shape [out, in] = [2D, D]
        "u_agg_Qw": linear_w(H, D), "u_agg_Kw": linear_w(H, D), "u_agg_Vw": linear_w(H, D),
        "i_agg_Qw": linear_w(H, D), "i_agg_Kw": linear_w(H, D), "i_agg_Vw": linear_w(H, D),
        "mlp_w1": linear_w(200, 14 * D), "mlp_b1": linear_b(200, 14 * D),
        "mlp_w2": linear_w(80, 200), "mlp_b2": linear_b(80, 200),
        "mlp_w3": linear_w(1, 80), "mlp_b3": linear_b(1, 80),
        "alpha1": jnp.zeros((1,), jnp.float32),
        "alpha2": jnp.zeros((1,), jnp.float32),
    }


# --------------------------------------------------------------------------- #
# Pure-JAX reference (literal transcription of the PyTorch forward, f32-exact)
# --------------------------------------------------------------------------- #
def reference_forward(x, params):
    hp = jax.lax.Precision.HIGHEST
    (user_id, user_1ord, user_2ord, user_recent,
     item_id, item_1ord, item_2ord, item_recent) = _split_x(x)
    bsz = x.shape[0]

    user_embedding = params["user_embed"][user_id]
    item_embedding = params["item_embed"][item_id]

    def weight(cnt):
        return jax.nn.softmax(jnp.log(cnt.astype(jnp.float32) + 1.0) / TAU, axis=1)[:, :, None]

    user_1ord_w = weight(user_1ord)
    user_2ord_w = weight(user_2ord)
    item_1ord_w = weight(item_1ord)
    item_2ord_w = weight(item_2ord)

    user_recent_mask = (user_recent > 0).astype(jnp.float32)[:, :, None]
    item_recent_mask = (item_recent > 0).astype(jnp.float32)[:, :, None]

    user_1ord_embedding = jnp.broadcast_to(params["i_macro_embed"], (bsz, I, D))
    user_2ord_embedding = jnp.broadcast_to(params["u_macro_embed"], (bsz, U, D))
    item_1ord_embedding = jnp.broadcast_to(params["u_macro_embed"], (bsz, U, D))
    item_2ord_embedding = jnp.broadcast_to(params["i_macro_embed"], (bsz, I, D))
    user_recent_embedding = params["item_embed"][user_recent]
    item_recent_embedding = params["user_embed"][item_recent]

    def agg(query, key_, Qw, Kw, Vw):
        tq = jnp.einsum("bnd,hd->bnh", query, Qw, precision=hp)
        tk = jnp.einsum("bmd,hd->bmh", key_, Kw, precision=hp)
        tv = jnp.einsum("bnd,hd->bnh", query, Vw, precision=hp)
        score = jax.nn.softmax(
            jnp.einsum("bnh,bmh->bnm", tq, tk, precision=hp) / math.sqrt(H), axis=-1)
        return tv * score

    uQ, uK, uV = params["u_agg_Qw"], params["u_agg_Kw"], params["u_agg_Vw"]
    iQ, iK, iV = params["i_agg_Qw"], params["i_agg_Kw"], params["i_agg_Vw"]

    u_1 = agg(user_1ord_embedding, item_embedding[:, None, :], iQ, iK, iV)
    u_2 = agg(user_2ord_embedding, user_embedding[:, None, :], uQ, uK, uV)
    i_1 = agg(item_1ord_embedding, user_embedding[:, None, :], uQ, uK, uV)
    i_2 = agg(item_2ord_embedding, item_embedding[:, None, :], iQ, iK, iV)
    u_r = agg(user_recent_embedding, item_embedding[:, None, :], iQ, iK, iV)
    i_r = agg(item_recent_embedding, user_embedding[:, None, :], uQ, uK, uV)

    user_1ord_ws = jnp.sum(u_1 * user_1ord_w, axis=1)
    user_2ord_ws = jnp.sum(u_2 * user_2ord_w, axis=1)
    item_1ord_ws = jnp.sum(i_1 * item_1ord_w, axis=1)
    item_2ord_ws = jnp.sum(i_2 * item_2ord_w, axis=1)
    user_recent_ws = jnp.sum(u_r * user_recent_mask, axis=1)
    item_recent_ws = jnp.sum(i_r * item_recent_mask, axis=1)

    concated = jnp.concatenate(
        [user_embedding, user_1ord_ws, user_2ord_ws, user_recent_ws,
         item_embedding, item_1ord_ws, item_2ord_ws, item_recent_ws], axis=1)

    def dice(h, alpha):
        avg = jnp.mean(h, axis=0)
        std = jnp.std(h, axis=0, ddof=1)
        norm = (h - avg) / std
        p = jax.nn.sigmoid(norm + 1e-8)
        return h * p + alpha * h * (1.0 - p)

    h1 = dice(jnp.dot(concated, params["mlp_w1"].T, precision=hp) + params["mlp_b1"],
              params["alpha1"])
    h2 = dice(jnp.dot(h1, params["mlp_w2"].T, precision=hp) + params["mlp_b2"],
              params["alpha2"])
    h3 = jnp.dot(h2, params["mlp_w3"].T, precision=hp) + params["mlp_b3"]
    return jax.nn.sigmoid(h3)


# --------------------------------------------------------------------------- #
# Main
# --------------------------------------------------------------------------- #
if __name__ == "__main__":
    key = jax.random.PRNGKey(0)
    k_in, k_par = jax.random.split(key)
    ks = jax.random.split(k_in, 8)

    N = NUM_REQ * B_BLK   # 4 independent requests of 8 rows each
    user_id = jax.random.randint(ks[0], (N, 1), 0, FIELD_DIMS[0])
    u1_cnt = jax.random.randint(ks[1], (N, I), 0, 100)
    u2_cnt = jax.random.randint(ks[2], (N, U), 0, 100)
    u_rec = jax.random.randint(ks[3], (N, R), 0, FIELD_DIMS[1])   # 0 acts as padding
    item_id = jax.random.randint(ks[4], (N, 1), 0, FIELD_DIMS[1])
    i1_cnt = jax.random.randint(ks[5], (N, U), 0, 100)
    i2_cnt = jax.random.randint(ks[6], (N, I), 0, 100)
    i_rec = jax.random.randint(ks[7], (N, R), 0, FIELD_DIMS[0])

    x = jnp.concatenate(
        [user_id, u1_cnt, u2_cnt, u_rec, item_id, i1_cnt, i2_cnt, i_rec],
        axis=1).astype(jnp.int32)
    assert x.shape == (N, TOTAL_COLS)

    params = init_params(k_par)
    folded = fold_params(params)          # one-time, batch-independent fold

    fwd = jax.jit(macgnn_forward)
    out = jax.block_until_ready(fwd(x, params, folded))

    # Reference: each 8-row request is an independent MacGNN forward (Dice
    # statistics are per-request, matching the kernel's grid semantics).
    ref = jnp.concatenate(
        [reference_forward(x[g * B_BLK:(g + 1) * B_BLK], params) for g in range(NUM_REQ)],
        axis=0)

    assert out.shape == (N, 1)
    assert bool(jnp.all(jnp.isfinite(out)))
    # Kernel uses single-pass bf16 MXU matmuls + approx reciprocal; reference is
    # explicit f32-highest, so allow a bf16-pass tolerance.
    assert bool(jnp.allclose(out, ref, atol=5e-3, rtol=5e-3)), (out, ref)

    print("KERNEL_OK")
</pallas_src>

<mosaic_0001>
module attributes {stable_mosaic.version = 11 : i64} {
  func.func @_macgnn_kernel(%arg0: i32, %arg1: memref<8x232xf32, #tpu.memory_space<vmem>>, %arg2: memref<232x200xbf16, #tpu.memory_space<vmem>>, %arg3: memref<200x80xbf16, #tpu.memory_space<vmem>>, %arg4: memref<4x256xf32, #tpu.memory_space<vmem>>, %arg5: memref<8x1xf32, #tpu.memory_space<vmem>>) attributes {dimension_semantics = [#tpu.dimension_semantics<parallel>], iteration_bounds = array<i64: 4>, scalar_prefetch = 0 : i64, scratch_operands = 0 : i64, tpu.core_type = #tpu.core_type<tc>, window_params = [{transform_indices = @transform_0, window_bounds = array<i64: 8, 232>}, {pipeline_mode = #tpu.pipeline_mode<synchronous>, transform_indices = @transform_1, window_bounds = array<i64: 232, 200>}, {pipeline_mode = #tpu.pipeline_mode<synchronous>, transform_indices = @transform_2, window_bounds = array<i64: 200, 80>}, {pipeline_mode = #tpu.pipeline_mode<synchronous>, transform_indices = @transform_3, window_bounds = array<i64: 4, 256>}, {transform_indices = @transform_4, window_bounds = array<i64: 8, 1>}]} {
    %c0 = arith.constant 0 : index
    %c0_0 = arith.constant 0 : index
    %0 = vector.load %arg1[%c0, %c0_0] : memref<8x232xf32, #tpu.memory_space<vmem>>, vector<8x232xf32>
    %1 = tpu.iota {dimensions = array<i32: 1>} : vector<8x232xi32>
    %c176_i32 = arith.constant 176 : i32
    %2 = vector.broadcast %c176_i32 : i32 to vector<8x232xi32>
    %3 = arith.cmpi sge, %1, %2 : vector<8x232xi32>
    %cst = arith.constant 0.000000e+00 : f32
    %4 = vector.broadcast %cst : f32 to vector<8x232xf32>
    %5 = arith.select %3, %0, %4 : vector<8x232xi1>, vector<8x232xf32>
    %cst_1 = arith.constant 1.000000e+00 : f32
    %6 = vector.broadcast %cst_1 : f32 to vector<8x232xf32>
    %7 = arith.addf %5, %6 : vector<8x232xf32>
    %8 = math.log %7 : vector<8x232xf32>
    %cst_2 = arith.constant 1.250000e+00 : f32
    %9 = vector.broadcast %cst_2 : f32 to vector<8x232xf32>
    %10 = arith.mulf %8, %9 : vector<8x232xf32>
    %11 = math.exp %10 : vector<8x232xf32>
    %cst_3 = arith.constant 1.000000e+00 : f32
    %12 = vector.broadcast %cst_3 : f32 to vector<8x232xf32>
    %c176_i32_4 = arith.constant 176 : i32
    %13 = vector.broadcast %c176_i32_4 : i32 to vector<8x232xi32>
    %14 = arith.cmpi sge, %1, %13 : vector<8x232xi32>
    %c192_i32 = arith.constant 192 : i32
    %15 = vector.broadcast %c192_i32 : i32 to vector<8x232xi32>
    %16 = arith.cmpi slt, %1, %15 : vector<8x232xi32>
    %17 = arith.andi %14, %16 : vector<8x232xi1>
    %cst_5 = arith.constant 0.000000e+00 : f32
    %18 = vector.broadcast %cst_5 : f32 to vector<8x232xf32>
    %19 = arith.select %17, %11, %18 : vector<8x232xi1>, vector<8x232xf32>
    %cst_6 = arith.constant dense<0.000000e+00> : vector<8xf32>
    %20 = vector.multi_reduction <add>, %19, %cst_6 [1] : vector<8x232xf32> to vector<8xf32>
    %21 = vector.shape_cast %20 : vector<8xf32> to vector<8x1xf32>
    %22 = vector.shape_cast %21 : vector<8x1xf32> to vector<8x1xf32>
    %23 = vector.broadcast %22 : vector<8x1xf32> to vector<8x232xf32>
    %24 = arith.select %17, %23, %12 : vector<8x232xi1>, vector<8x232xf32>
    %c192_i32_7 = arith.constant 192 : i32
    %25 = vector.broadcast %c192_i32_7 : i32 to vector<8x232xi32>
    %26 = arith.cmpi sge, %1, %25 : vector<8x232xi32>
    %c204_i32 = arith.constant 204 : i32
    %27 = vector.broadcast %c204_i32 : i32 to vector<8x232xi32>
    %28 = arith.cmpi slt, %1, %27 : vector<8x232xi32>
    %29 = arith.andi %26, %28 : vector<8x232xi1>
    %cst_8 = arith.constant 0.000000e+00 : f32
    %30 = vector.broadcast %cst_8 : f32 to vector<8x232xf32>
    %31 = arith.select %29, %11, %30 : vector<8x232xi1>, vector<8x232xf32>
    %cst_9 = arith.constant dense<0.000000e+00> : vector<8xf32>
    %32 = vector.multi_reduction <add>, %31, %cst_9 [1] : vector<8x232xf32> to vector<8xf32>
    %33 = vector.shape_cast %32 : vector<8xf32> to vector<8x1xf32>
    %34 = vector.shape_cast %33 : vector<8x1xf32> to vector<8x1xf32>
    %35 = vector.broadcast %34 : vector<8x1xf32> to vector<8x232xf32>
    %36 = arith.select %29, %35, %24 : vector<8x232xi1>, vector<8x232xf32>
    %c204_i32_10 = arith.constant 204 : i32
    %37 = vector.broadcast %c204_i32_10 : i32 to vector<8x232xi32>
    %38 = arith.cmpi sge, %1, %37 : vector<8x232xi32>
    %c216_i32 = arith.constant 216 : i32
    %39 = vector.broadcast %c216_i32 : i32 to vector<8x232xi32>
    %40 = arith.cmpi slt, %1, %39 : vector<8x232xi32>
    %41 = arith.andi %38, %40 : vector<8x232xi1>
    %cst_11 = arith.constant 0.000000e+00 : f32
    %42 = vector.broadcast %cst_11 : f32 to vector<8x232xf32>
    %43 = arith.select %41, %11, %42 : vector<8x232xi1>, vector<8x232xf32>
    %cst_12 = arith.constant dense<0.000000e+00> : vector<8xf32>
    %44 = vector.multi_reduction <add>, %43, %cst_12 [1] : vector<8x232xf32> to vector<8xf32>
    %45 = vector.shape_cast %44 : vector<8xf32> to vector<8x1xf32>
    %46 = vector.shape_cast %45 : vector<8x1xf32> to vector<8x1xf32>
    %47 = vector.broadcast %46 : vector<8x1xf32> to vector<8x232xf32>
    %48 = arith.select %41, %47, %36 : vector<8x232xi1>, vector<8x232xf32>
    %c216_i32_13 = arith.constant 216 : i32
    %49 = vector.broadcast %c216_i32_13 : i32 to vector<8x232xi32>
    %50 = arith.cmpi sge, %1, %49 : vector<8x232xi32>
    %c232_i32 = arith.constant 232 : i32
    %51 = vector.broadcast %c232_i32 : i32 to vector<8x232xi32>
    %52 = arith.cmpi slt, %1, %51 : vector<8x232xi32>
    %53 = arith.andi %50, %52 : vector<8x232xi1>
    %cst_14 = arith.constant 0.000000e+00 : f32
    %54 = vector.broadcast %cst_14 : f32 to vector<8x232xf32>
    %55 = arith.select %53, %11, %54 : vector<8x232xi1>, vector<8x232xf32>
    %cst_15 = arith.constant dense<0.000000e+00> : vector<8xf32>
    %56 = vector.multi_reduction <add>, %55, %cst_15 [1] : vector<8x232xf32> to vector<8xf32>
    %57 = vector.shape_cast %56 : vector<8xf32> to vector<8x1xf32>
    %58 = vector.shape_cast %57 : vector<8x1xf32> to vector<8x1xf32>
    %59 = vector.broadcast %58 : vector<8x1xf32> to vector<8x232xf32>
    %60 = arith.select %53, %59, %48 : vector<8x232xi1>, vector<8x232xf32>
    %61 = tpu.reciprocal %60 {approx = true} : vector<8x232xf32> -> vector<8x232xf32>
    %62 = arith.mulf %11, %61 : vector<8x232xf32>
    %63 = arith.select %3, %62, %0 : vector<8x232xi1>, vector<8x232xf32>
    %c0_16 = arith.constant 0 : index
    %c0_17 = arith.constant 0 : index
    %64 = vector.load %arg4[%c0_16, %c0_17] : memref<4x256xf32, #tpu.memory_space<vmem>>, vector<4x256xf32>
    %65 = vector.extract_strided_slice %64 {offsets = [0, 0], sizes = [1, 200], strides = [1, 1]} : vector<4x256xf32> to vector<1x200xf32>
    %66 = vector.extract_strided_slice %64 {offsets = [1, 0], sizes = [1, 80], strides = [1, 1]} : vector<4x256xf32> to vector<1x80xf32>
    %67 = vector.extract_strided_slice %64 {offsets = [2, 0], sizes = [1, 80], strides = [1, 1]} : vector<4x256xf32> to vector<1x80xf32>
    %68 = vector.extract_strided_slice %64 {offsets = [3, 0], sizes = [1, 1], strides = [1, 1]} : vector<4x256xf32> to vector<1x1xf32>
    %69 = vector.extract_strided_slice %64 {offsets = [3, 1], sizes = [1, 1], strides = [1, 1]} : vector<4x256xf32> to vector<1x1xf32>
    %70 = vector.extract_strided_slice %64 {offsets = [3, 2], sizes = [1, 1], strides = [1, 1]} : vector<4x256xf32> to vector<1x1xf32>
    %71 = arith.truncf %63 : vector<8x232xf32> to vector<8x232xbf16>
    %c0_18 = arith.constant 0 : index
    %c0_19 = arith.constant 0 : index
    %72 = vector.load %arg2[%c0_18, %c0_19] : memref<232x200xbf16, #tpu.memory_space<vmem>>, vector<232x200xbf16>
    %cst_20 = arith.constant dense<0.000000e+00> : vector<8x200xf32>
    %73 = tpu.matmul %71, %72, %cst_20 {dimension_numbers = #tpu.dot_dimension_numbers<[1], [0], [0], [1], [0, 0, 1, 1], [], []>} : vector<8x232xbf16>, vector<232x200xbf16>, vector<8x200xf32> -> vector<8x200xf32>
    %74 = vector.broadcast %65 : vector<1x200xf32> to vector<8x200xf32>
    %75 = arith.addf %73, %74 : vector<8x200xf32>
    %cst_21 = arith.constant dense<0.000000e+00> : vector<200xf32>
    %76 = vector.multi_reduction <add>, %75, %cst_21 [0] : vector<8x200xf32> to vector<200xf32>
    %77 = vector.shape_cast %76 : vector<200xf32> to vector<1x200xf32>
    %78 = arith.mulf %75, %75 : vector<8x200xf32>
    %cst_22 = arith.constant dense<0.000000e+00> : vector<200xf32>
    %79 = vector.multi_reduction <add>, %78, %cst_22 [0] : vector<8x200xf32> to vector<200xf32>
    %80 = vector.shape_cast %79 : vector<200xf32> to vector<1x200xf32>
    %cst_23 = arith.constant 1.250000e-01 : f32
    %81 = vector.broadcast %cst_23 : f32 to vector<1x200xf32>
    %82 = arith.mulf %77, %81 : vector<1x200xf32>
    %cst_24 = arith.constant 8.000000e+00 : f32
    %83 = vector.broadcast %cst_24 : f32 to vector<1x200xf32>
    %84 = arith.mulf %83, %82 : vector<1x200xf32>
    %85 = arith.mulf %84, %82 : vector<1x200xf32>
    %86 = arith.subf %80, %85 : vector<1x200xf32>
    %cst_25 = arith.constant 0.142857149 : f32
    %87 = vector.broadcast %cst_25 : f32 to vector<1x200xf32>
    %88 = arith.mulf %86, %87 : vector<1x200xf32>
    %89 = vector.broadcast %82 : vector<1x200xf32> to vector<8x200xf32>
    %90 = arith.subf %75, %89 : vector<8x200xf32>
    %91 = math.rsqrt %88 : vector<1x200xf32>
    %92 = vector.broadcast %91 : vector<1x200xf32> to vector<8x200xf32>
    %93 = arith.mulf %90, %92 : vector<8x200xf32>
    %cst_26 = arith.constant 9.99999993E-9 : f32
    %94 = vector.broadcast %cst_26 : f32 to vector<8x200xf32>
    %95 = arith.addf %93, %94 : vector<8x200xf32>
    %96 = arith.negf %95 : vector<8x200xf32>
    %97 = math.exp %96 : vector<8x200xf32>
    %cst_27 = arith.constant 1.000000e+00 : f32
    %98 = vector.broadcast %cst_27 : f32 to vector<8x200xf32>
    %99 = arith.addf %98, %97 : vector<8x200xf32>
    %100 = arith.divf %98, %99 : vector<8x200xf32>
    %101 = arith.mulf %75, %100 : vector<8x200xf32>
    %102 = vector.broadcast %69 : vector<1x1xf32> to vector<8x200xf32>
    %103 = arith.mulf %102, %75 : vector<8x200xf32>
    %cst_28 = arith.constant 1.000000e+00 : f32
    %104 = vector.broadcast %cst_28 : f32 to vector<8x200xf32>
    %105 = arith.subf %104, %100 : vector<8x200xf32>
    %106 = arith.mulf %103, %105 : vector<8x200xf32>
    %107 = arith.addf %101, %106 : vector<8x200xf32>
    %108 = arith.truncf %107 : vector<8x200xf32> to vector<8x200xbf16>
    %c0_29 = arith.constant 0 : index
    %c0_30 = arith.constant 0 : index
    %109 = vector.load %arg3[%c0_29, %c0_30] : memref<200x80xbf16, #tpu.memory_space<vmem>>, vector<200x80xbf16>
    %cst_31 = arith.constant dense<0.000000e+00> : vector<8x80xf32>
    %110 = tpu.matmul %108, %109, %cst_31 {dimension_numbers = #tpu.dot_dimension_numbers<[1], [0], [0], [1], [0, 0, 1, 1], [], []>} : vector<8x200xbf16>, vector<200x80xbf16>, vector<8x80xf32> -> vector<8x80xf32>
    %111 = vector.broadcast %66 : vector<1x80xf32> to vector<8x80xf32>
    %112 = arith.addf %110, %111 : vector<8x80xf32>
    %cst_32 = arith.constant dense<0.000000e+00> : vector<80xf32>
    %113 = vector.multi_reduction <add>, %112, %cst_32 [0] : vector<8x80xf32> to vector<80xf32>
    %114 = vector.shape_cast %113 : vector<80xf32> to vector<1x80xf32>
    %115 = arith.mulf %112, %112 : vector<8x80xf32>
    %cst_33 = arith.constant dense<0.000000e+00> : vector<80xf32>
    %116 = vector.multi_reduction <add>, %115, %cst_33 [0] : vector<8x80xf32> to vector<80xf32>
    %117 = vector.shape_cast %116 : vector<80xf32> to vector<1x80xf32>
    %cst_34 = arith.constant 1.250000e-01 : f32
    %118 = vector.broadcast %cst_34 : f32 to vector<1x80xf32>
    %119 = arith.mulf %114, %118 : vector<1x80xf32>
    %cst_35 = arith.constant 8.000000e+00 : f32
    %120 = vector.broadcast %cst_35 : f32 to vector<1x80xf32>
    %121 = arith.mulf %120, %119 : vector<1x80xf32>
    %122 = arith.mulf %121, %119 : vector<1x80xf32>
    %123 = arith.subf %117, %122 : vector<1x80xf32>
    %cst_36 = arith.constant 0.142857149 : f32
    %124 = vector.broadcast %cst_36 : f32 to vector<1x80xf32>
    %125 = arith.mulf %123, %124 : vector<1x80xf32>
    %126 = vector.broadcast %119 : vector<1x80xf32> to vector<8x80xf32>
    %127 = arith.subf %112, %126 : vector<8x80xf32>
    %128 = math.rsqrt %125 : vector<1x80xf32>
    %129 = vector.broadcast %128 : vector<1x80xf32> to vector<8x80xf32>
    %130 = arith.mulf %127, %129 : vector<8x80xf32>
    %cst_37 = arith.constant 9.99999993E-9 : f32
    %131 = vector.broadcast %cst_37 : f32 to vector<8x80xf32>
    %132 = arith.addf %130, %131 : vector<8x80xf32>
    %133 = arith.negf %132 : vector<8x80xf32>
    %134 = math.exp %133 : vector<8x80xf32>
    %cst_38 = arith.constant 1.000000e+00 : f32
    %135 = vector.broadcast %cst_38 : f32 to vector<8x80xf32>
    %136 = arith.addf %135, %134 : vector<8x80xf32>
    %137 = arith.divf %135, %136 : vector<8x80xf32>
    %138 = arith.mulf %112, %137 : vector<8x80xf32>
    %139 = vector.broadcast %70 : vector<1x1xf32> to vector<8x80xf32>
    %140 = arith.mulf %139, %112 : vector<8x80xf32>
    %cst_39 = arith.constant 1.000000e+00 : f32
    %141 = vector.broadcast %cst_39 : f32 to vector<8x80xf32>
    %142 = arith.subf %141, %137 : vector<8x80xf32>
    %143 = arith.mulf %140, %142 : vector<8x80xf32>
    %144 = arith.addf %138, %143 : vector<8x80xf32>
    %145 = vector.broadcast %67 : vector<1x80xf32> to vector<8x80xf32>
    %146 = arith.mulf %144, %145 : vector<8x80xf32>
    %cst_40 = arith.constant dense<0.000000e+00> : vector<8xf32>
    %147 = vector.multi_reduction <add>, %146, %cst_40 [1] : vector<8x80xf32> to vector<8xf32>
    %148 = vector.shape_cast %147 : vector<8xf32> to vector<8x1xf32>
    %149 = vector.broadcast %68 : vector<1x1xf32> to vector<8x1xf32>
    %150 = arith.addf %148, %149 : vector<8x1xf32>
    %151 = arith.negf %150 : vector<8x1xf32>
    %152 = math.exp %151 : vector<8x1xf32>
    %cst_41 = arith.constant 1.000000e+00 : f32
    %153 = vector.broadcast %cst_41 : f32 to vector<8x1xf32>
    %154 = arith.addf %153, %152 : vector<8x1xf32>
    %155 = arith.divf %153, %154 : vector<8x1xf32>
    %c0_42 = arith.constant 0 : index
    %c0_43 = arith.constant 0 : index
    %156 = vector.load %arg5[%c0_42, %c0_43] : memref<8x1xf32, #tpu.memory_space<vmem>>, vector<8x1xf32>
    tpu.vector_store %arg5[%c0_42, %c0_43], %155 {strides = array<i32>} : memref<8x1xf32, #tpu.memory_space<vmem>>, vector<8x1xf32>,
    return
  }
  func.func @transform_0(%arg0: i32) -> (i32, i32) {
    %c0_i32 = arith.constant 0 : i32
    %c0_i32_0 = arith.constant 0 : i32
    return %arg0, %c0_i32 : i32, i32
  }
  func.func @transform_1(%arg0: i32) -> (i32, i32) {
    %c0_i32 = arith.constant 0 : i32
    %c0_i32_0 = arith.constant 0 : i32
    %c0_i32_1 = arith.constant 0 : i32
    return %c0_i32, %c0_i32_0 : i32, i32
  }
  func.func @transform_2(%arg0: i32) -> (i32, i32) {
    %c0_i32 = arith.constant 0 : i32
    %c0_i32_0 = arith.constant 0 : i32
    %c0_i32_1 = arith.constant 0 : i32
    return %c0_i32, %c0_i32_0 : i32, i32
  }
  func.func @transform_3(%arg0: i32) -> (i32, i32) {
    %c0_i32 = arith.constant 0 : i32
    %c0_i32_0 = arith.constant 0 : i32
    %c0_i32_1 = arith.constant 0 : i32
    return %c0_i32, %c0_i32_0 : i32, i32
  }
  func.func @transform_4(%arg0: i32) -> (i32, i32) {
    %c0_i32 = arith.constant 0 : i32
    %c0_i32_0 = arith.constant 0 : i32
    return %arg0, %c0_i32 : i32, i32
  }
}

</mosaic_0001>

<bundles_post_ra>
// kernel: macgnn_forward.1
= control target key start
LH: loop header
LB: loop body
LE: loop exit
PB: predicated region body
PF: predicated region fallthrough
CT: control target
= control target key end

     0   :  { %s1068_s15 = smov 0   ;;  %s1326_s0 = inlined_call_operand.vmem [shape: f32[32,232], index: 0, kind: input, shape index: {}]   ;;  %s1327_s1 = inlined_call_operand.vmem [shape: bf16[232,200], index: 1, kind: input, shape index: {}]   ;;  %s1328_s2 = inlined_call_operand.vmem [shape: bf16[200,80], index: 2, kind: input, shape index: {}]   ;;  %s1329_s3 = inlined_call_operand.vmem [shape: f32[4,256], index: 3, kind: input, shape index: {}]   ;;  %s1330_s4 = inlined_call_operand.vmem [shape: f32[32,1], index: 4, kind: output, shape index: {}]  }
   0x1 LB: > { %s871_s16 = sadd.s32 4294967295, %s1038_s15   ;;  %p875_p0 = scmp.ge.s32.totalorder %s1038_s15, 1  ;;  %s1038_s15 = sphi %s1068_s15, %s14_s15  }
   0x2   : > { %p162_p1 = scmp.lt.s32.totalorder %s1038_s15, 5 }
   0x4   : > { %p163_p2 = pnand %p875_p0, %p162_p1 }
   0x5   : > { %p187_p3 = scmp.lt.s32.totalorder (!%p163_p2), %s871_s16, 3  ;;  %s1040_s9 = smov (!%p163_p2), 127  }
   0x6   : > { %166 = sbr.rel (%p163_p2) target bundleno = 951 (0x3b7), region = 36 }
   0xb   : > { %v199_v0 = vlaneseq  ;;  %v947_v1 = vld [vmem:[%s1327_s1 + $0x74] ss:$8 sps:$4 sm:$0xff]   ;;  %v949_v2 = vld [vmem:[%s1327_s1 + $0x70] ss:$8 sps:$4 sm:$0xff]   ;;  %s1340_s16 = smov (!%p187_p3, %s871_s16), 3  ;;  %v310_v22 = vld [vmem:[%s1327_s1 + $0xe0] sm:$0xff] }
   0xc   : > { %485 = vmatprep.subr.bf16.mxu0 %v947_v1  ;;  %v950_v4 = vld [vmem:[%s1327_s1 + $0x64] ss:$8 sps:$4 sm:$0xff]   ;;  %v952_v5 = vld [vmem:[%s1327_s1 + $0x60] ss:$8 sps:$4 sm:$0xff]   ;;  %s931_s25 = sshll.u32 %s1340_s16, 4  ;;  %v908_v27 = vcombine.high %v310_v22, %v310_v22  ;;  %vm478_vm1 = vcmask 1043456   ;;  %v907_v41 = vcombine.low %v310_v22, %v310_v22 }
   0xd   : > { %v200_v3 = vand.u32 127, %v199_v0  ;;  %486 = vmatpush1.bf16.msra.mxu0 %v949_v2  ;;  %v953_v7 = vld [vmem:[%s1327_s1 + $0x54] ss:$8 sps:$4 sm:$0xff]   ;;  %s1100_s30 = scalar_lea.vmem %s1326_s0, %s931_s25  ;;  %v955_v10 = vld [vmem:[%s1327_s1 + $0x50] ss:$8 sps:$4 sm:$0xff]   ;;  %vm224_vm13 = vcmask 850944  }
   0xe   : > { %487 = vmatprep.subr.bf16.mxu0 %v950_v4  ;;  %v1103_v8 = vld [vmem:[%s1100_s30 + $0x8] sm:$0xff]  ;;  %v959_v14 = vld [vmem:[%s1327_s1 + $0x34] ss:$8 sps:$4 sm:$0xff]   ;;  %v961_v15 = vld [vmem:[%s1327_s1 + $0x30] ss:$8 sps:$4 sm:$0xff]   ;;  %v480_v42 = vsel %vm478_vm1, %v907_v41, 0 }
   0xf   : > { %v1092_v6 = vadd.s32 128, %v200_v3  ;;  %v956_v12 = vld [vmem:[%s1327_s1 + $0x44] ss:$8 sps:$4 sm:$0xff]   ;;  %v958_v13 = vld [vmem:[%s1327_s1 + $0x40] ss:$8 sps:$4 sm:$0xff]   ;;  %v1221_v55 = vshrl.u32 %v199_v0, 7 }
  0x10   : > { %v962_v16 = vld [vmem:[%s1327_s1 + $0x24] ss:$8 sps:$4 sm:$0xff]   ;;  %v964_v17 = vld [vmem:[%s1327_s1 + $0x20] ss:$8 sps:$4 sm:$0xff]   ;;  %v965_v18 = vld [vmem:[%s1327_s1 + $0x14] ss:$8 sps:$4 sm:$0xff]  }
  0x11   : > { %vm203_vm0 = vcmp.ge.s32.totalorder %v1092_v6, 176  ;;  %488 = vmatpush1.bf16.msra.mxu0 %v952_v5  ;;  %v967_v19 = vld [vmem:[%s1327_s1 + $0x10] ss:$8 sps:$4 sm:$0xff]   ;;  %v968_v20 = vld [vmem:[%s1327_s1 + $0x4] ss:$8 sps:$4 sm:$0xff]   ;;  %vm219_vm2 = vcmp.lt.s32.totalorder %v1092_v6, 192 }
  0x12   : > { %v205_v9 = vsel %vm203_vm0, %v1103_v8, 0.0  ;;  %489 = vmatprep.subr.bf16.mxu0 %v953_v7  ;;  %v970_v25 = vld [vmem:[%s1327_s1] ss:$8 sps:$4 sm:$0xff]   ;;  %vm246_vm3 = vcmp.ge.s32.totalorder %v1092_v6, 204  ;;  %vm248_vm4 = vcmp.lt.s32.totalorder %v1092_v6, 216  ;;  %vm232_vm5 = vcmp.ge.s32.totalorder %v1092_v6, 192  ;;  %vm1153_vm7 = vmand %vm203_vm0, %vm219_vm2 }
  0x13   : > { %v207_v11 = vadd.f32 1.0, %v205_v9  ;;  %vm234_vm6 = vcmp.lt.s32.totalorder %v1092_v6, 204  ;;  %vm260_vm8 = vcmp.ge.s32.totalorder %v1092_v6, 216  ;;  %vm262_vm9 = vcmp.lt.s32.totalorder %v1092_v6, 232  ;;  %vm1159_vm10 = vmand %vm246_vm3, %vm248_vm4  ;;  %v973_v43 = vld [vmem:[%s1327_s1 + $0xd4] ss:$8 sps:$4 sm:$0xff]  }
  0x14   : > { %vm1163_vm11 = vmand %vm232_vm5, %vm234_vm6  ;;  %v975_v44 = vld [vmem:[%s1327_s1 + $0xd0] ss:$8 sps:$4 sm:$0xff]   ;;  %v976_v45 = vld [vmem:[%s1327_s1 + $0xc4] ss:$8 sps:$4 sm:$0xff]   ;;  %v589_v57 = vsub.s32 3, %v1221_v55  ;;  %vm532_vm14 = vcmask 588800  }
  0x15   : > { %1004 = vlog2.f32 %v207_v11  ;;  %490 = vmatpush1.bf16.msra.mxu0 %v955_v10  ;;  %vm1167_vm12 = vmand %vm260_vm8, %vm262_vm9  ;;  %v978_v46 = vld [vmem:[%s1327_s1 + $0xc0] ss:$8 sps:$4 sm:$0xff]   ;;  %v979_v47 = vld [vmem:[%s1327_s1 + $0xb4] ss:$8 sps:$4 sm:$0xff]   ;;  %vm756_vm15 = vcmask 654336   ;;  %s878_s14 = sshll.u32 %s1340_s16, 3 }
  0x16   : > { %491 = vmatprep.subr.bf16.mxu0 %v956_v12  ;;  %v981_v48 = vld [vmem:[%s1327_s1 + $0xb0] ss:$8 sps:$4 sm:$0xff]   ;;  %v982_v49 = vld [vmem:[%s1327_s1 + $0xa4] ss:$8 sps:$4 sm:$0xff]   ;;  %v984_v50 = vld [vmem:[%s1327_s1 + $0xa0] ss:$8 sps:$4 sm:$0xff]   ;;  %s195_s19 = scalar_lea.vmem %s1330_s4, %s878_s14 }
  0x17   : > { %v985_v51 = vld [vmem:[%s1327_s1 + $0x94] ss:$8 sps:$4 sm:$0xff]   ;;  %v987_v52 = vld [vmem:[%s1327_s1 + $0x90] ss:$8 sps:$4 sm:$0xff]   ;;  %v988_v53 = vld [vmem:[%s1327_s1 + $0x84] ss:$8 sps:$4 sm:$0xff]  }
  0x18   : > { %v990_v54 = vld [vmem:[%s1327_s1 + $0x80] ss:$8 sps:$4 sm:$0xff]   ;;  %v991_v12 = vld [vmem:[%s1328_s2 + $0x38] sm:$0xff]   ;;  %v1001_v22 = vld [vmem:[%s1328_s2 + $0x50] sm:$0xff]  }
  0x19   : > { %492 = vmatpush1.bf16.msra.mxu0 %v958_v13  ;;  %v1226_v56 = vld [vmem:[%s1329_s3] sm:$0xff]  ;;  %v1041_v13 = vmov 0   ;;  %v993_v6 = vld [vmem:[%s1328_s2 + $0x28] sm:$0xff]  }
  0x1a   : > { %493 = vmatprep.subr.bf16.mxu0 %v959_v14  ;;  %v1230_v58 = vrot.slane %v1226_v56, %v589_v57  ;;  %v197_v5 = vld [vmem:[%s1100_s30] sm:$0xff]  ;;  %716 = vmatprep.subr.bf16.mxu1 %v1041_v13  ;;  %v992_v14 = vld [vmem:[%s1328_s2 + $0x30] sm:$0xff]   ;;  %s1042_s30 = smov 126  }
  0x1b   : > { %v280_v10 = vpack.c.bf16 %v197_v5, %v197_v5  ;;  %717 = vmatpush1.bf16.msra.mxu1 %v991_v12 }
  0x1c   : > { %718 = vmatprep.subr.bf16.mxu1 %v1041_v13 }
  0x1d   : > { %494 = vmatpush1.bf16.msra.mxu0 %v961_v15  ;;  %v995_v15 = vld [vmem:[%s1328_s2 + $0x18] sm:$0xff]  }
  0x1e   : > { %495 = vmatprep.subr.bf16.mxu0 %v962_v16  ;;  %v996_v16 = vld [vmem:[%s1328_s2 + $0x10] sm:$0xff]  }
  0x1f   : > { %719 = vmatpush1.bf16.msra.mxu1 %v992_v14 }
  0x20   : > { %720 = vmatprep.subr.bf16.mxu1 %v1041_v13 }
  0x21   : > { %496 = vmatpush1.bf16.msra.mxu0 %v964_v17  ;;  %v997_v17 = vld [vmem:[%s1328_s2 + $0x8] sm:$0xff]  }
  0x22   : > { %v1005_v21 = vpop.eup %1004  ;;  %497 = vmatprep.subr.bf16.mxu0 %v965_v18  ;;  %v998_v18 = vld [vmem:[%s1328_s2] sm:$0xff]  }
  0x23   : > { %v211_v23 = vmul.f32 0.6931472, %v1005_v21  ;;  %721 = vmatpush1.bf16.msra.mxu1 %v993_v6  ;;  %v1000_v21 = vld [vmem:[%s1328_s2 + $0x58] sm:$0xff]  }
  0x24   : > { %722 = vmatprep.subr.bf16.mxu1 %v1041_v13 }
  0x25   : > { %v213_v24 = vmul.f32 1.25, %v211_v23  ;;  %498 = vmatpush1.bf16.msra.mxu0 %v967_v19  ;;  %v999_v19 = vld [vmem:[%s1328_s2 + $0x60] ss:$0 sps:$4 sm:$0xff]   ;;  %v1002_v23 = vld [vmem:[%s1328_s2 + $0x48] sm:$0xff]  }
  0x26   : > { %499 = vmatprep.subr.bf16.mxu0 %v968_v20  ;;  %v714_v20 = vsel %vm478_vm1, %v999_v19, 0 }
  0x27   : > { %v216_v26 = vmul.f32 1.442695, %v213_v24  ;;  %v1003_v24 = vld [vmem:[%s1328_s2 + $0x40] sm:$0xff]  }
  0x29   : > { %1006 = vpow2.f32 %v216_v26  ;;  %500 = vmatpush1.bf16.msra.mxu0 %v970_v25  ;;  %v314_v25 = vsub.s32 0, %v1221_v55  ;;  %v318_v26 = vsub.s32 4, %v1221_v55 }
  0x2a   : > { %909 = vmatprep.subr.msk.bf16.mxu0 %vm478_vm1, %v908_v27 }
  0x2b   : > { %v315_v27 = vrot.slane %v1226_v56, %v314_v25  ;;  %v319_v28 = vrot.slane %v1226_v56, %v318_v26 }
  0x2d   : > { %504 = vmatpush2.bf16.msra.mxu0 %v480_v42  ;;  %v325_v29 = vrot.slane %v315_v27, %v314_v25  ;;  %v329_v30 = vrot.slane %v319_v28, %v314_v25 }
  0x2e   : > { %505 = vmatprep.subr.bf16.mxu0 %v973_v43 }
  0x31   : > { %506 = vmatpush2.bf16.msra.mxu0 %v975_v44 }
  0x32   : > { %507 = vmatprep.subr.bf16.mxu0 %v976_v45 }
  0x35   : > { %508 = vmatpush2.bf16.msra.mxu0 %v978_v46 }
  0x36   : > { %v1007_v32 = vpop.eup %1006  ;;  %509 = vmatprep.subr.bf16.mxu0 %v979_v47 }
  0x37   : > { %v223_v33 = vsel %vm1153_vm7, %v1007_v32, 0.0  ;;  %v252_v34 = vsel %vm1159_vm10, %v1007_v32, 0.0  ;;  %v238_v35 = vsel %vm1163_vm11, %v1007_v32, 0.0  ;;  %v266_v36 = vsel %vm1167_vm12, %v1007_v32, 0.0 }
  0x38   : > { %v225_v37 = vsel %vm224_vm13, %v223_v33, 0.0  ;;  %v253_v38 = vsel %vm224_vm13, %v252_v34, 0.0  ;;  %v239_v39 = vsel %vm224_vm13, %v238_v35, 0.0  ;;  %v267_v40 = vsel %vm224_vm13, %v266_v36, 0.0 }
  0x39   : > { %227 = vadd.xlane.f32.xlu0 %v225_v37  ;;  %255 = vadd.xlane.f32.xlu1 %v253_v38 }
  0x3a   : > { %510 = vmatpush2.bf16.msra.mxu0 %v981_v48 }
  0x3b   : > { %511 = vmatprep.subr.bf16.mxu0 %v982_v49 }
  0x3d   : > { %241 = vadd.xlane.f32.xlu0 %v239_v39  ;;  %269 = vadd.xlane.f32.xlu1 %v267_v40 }
  0x3e   : > { %512 = vmatpush2.bf16.msra.mxu0 %v984_v50 }
  0x3f   : > { %513 = vmatprep.subr.bf16.mxu0 %v985_v51 }
  0x42   : > { %514 = vmatpush2.bf16.msra.mxu0 %v987_v52 }
  0x43   : > { %515 = vmatprep.subr.bf16.mxu0 %v988_v53 }
  0x46   : > { %516 = vmatpush2.bf16.msra.mxu0 %v990_v54 }
  0x4e   : > { %788 = vrot.lane.b32.xlu1 %v1230_v58, %s1042_s30 }
  0x53   : > { %591 = vrot.lane.b32.xlu0 %v1230_v58, %s1040_s9 }
  0xc2   : > { %v228_v59 = vpop.xlane.xlu0 %227  ;;  %v256_v60 = vpop.xlane.xlu1 %255 }
  0xc3   : > { %v230_v61 = vsel %vm1153_vm7, %v228_v59, 1.0 }
  0xc6   : > { %v242_v62 = vpop.xlane.xlu0 %241  ;;  %v270_v63 = vpop.xlane.xlu1 %269 }
  0xc7   : > { %v244_v0 = vsel %vm1163_vm11, %v242_v62, %v230_v61 }
  0xc8   : > { %v258_v1 = vsel %vm1159_vm10, %v256_v60, %v244_v0 }
  0xc9   : > { %v272_v2 = vsel %vm1167_vm12, %v270_v63, %v258_v1 }
  0xca   : > { %1008 = vrcp.f32 %v272_v2  ;;  %v592_v3 = vpop.permute.xlu0 %591 }
  0xcb   : > { %932 = vpush %v592_v3 }
  0xd7   : > { %v1009_v4 = vpop.eup %1008 }
  0xd8   : > { %v276_v7 = vmul.f32 %v1009_v4, %v1007_v32 }
  0xda   : > { %v278_v9 = vsel %vm203_vm0, %v276_v7, %v1103_v8  ;;  %v994_v8 = vld [vmem:[%s1328_s2 + $0x20] sm:$0xff]   ;;  %vm816_vm0 = vcmask 7168  }
  0xdb   : > { %v281_v11 = vpack.c.bf16 %v278_v9, %v278_v9  ;;  %723 = vmatpush1.bf16.msra.mxu1 %v994_v8 }
  0xdc   : > { %724 = vmatprep.subr.bf16.mxu1 %v1041_v13 }
  0xdd   : > { %910 = vmatprep.mubr.msk.bf16.mxu0 %vm224_vm13, %v281_v11 }
  0xde   : > { %518 = vmatmul.mubr.bf16.vlgmr.msra.gmra.mxu0 %v280_v10 }
  0xdf   : > { %725 = vmatpush1.bf16.msra.mxu1 %v995_v15 }
  0xe0   : > { %726 = vmatprep.subr.bf16.mxu1 %v1041_v13 }
  0xe3   : > { %727 = vmatpush1.bf16.msra.mxu1 %v996_v16 }
  0xe4   : > { %728 = vmatprep.subr.bf16.mxu1 %v1041_v13 }
  0xe7   : > { %729 = vmatpush1.bf16.msra.mxu1 %v997_v17 }
  0xe8   : > { %730 = vmatprep.subr.bf16.mxu1 %v1041_v13 }
  0xeb   : > { %731 = vmatpush1.bf16.msra.mxu1 %v998_v18 }
  0xec   : > { %738 = vmatprep.subr.bf16.mxu1 %v1041_v13 }
  0xef   : > { %739 = vmatpush2.bf16.msra.mxu1 %v714_v20 }
  0xf0   : > { %740 = vmatprep.subr.bf16.mxu1 %v1041_v13 }
  0xf3   : > { %741 = vmatpush2.bf16.msra.mxu1 %v1000_v21 }
  0xf4   : > { %742 = vmatprep.subr.bf16.mxu1 %v1041_v13 }
  0xf7   : > { %743 = vmatpush2.bf16.msra.mxu1 %v1001_v22 }
  0xf8   : > { %744 = vmatprep.subr.bf16.mxu1 %v1041_v13 }
  0xfb   : > { %745 = vmatpush2.bf16.msra.mxu1 %v1002_v23 }
  0xfc   : > { %746 = vmatprep.subr.bf16.mxu1 %v1041_v13  ;;  %s933_s12 = spop %932 }
  0xfd   : > { %v594_v28 = vstv %s933_s12 }
  0xff   : > { %747 = vmatpush2.bf16.msra.mxu1 %v1003_v24 }
 0x19e   : > { %v519_v31 = vpop.f32.mrf.mxu0 }
 0x19f   : > { %v1291_v32 = vadd.f32 %v519_v31, %v325_v29 }
 0x1a0   : > { %v521_v33 = vpop.f32.mrf.mxu0 }
 0x1a1   : > { %v526_v34 = vrot.slane %v1291_v32, 4  ;;  %v540_v35 = vmul.f32 %v1291_v32, %v1291_v32  ;;  %v1296_v36 = vadd.f32 %v521_v33, %v329_v30  ;;  %v789_v30 = vpop.permute.xlu1 %788  ;;  %v596_v31 = vmul.f32 %v594_v28, %v1291_v32 }
 0x1a2   : > { %v523_v37 = vpop.f32.mrf.mxu0  ;;  %934 = vpush %v789_v30 }
 0x1a3   : > { %v527_v38 = vadd.f32 %v526_v34, %v1291_v32  ;;  %v542_v39 = vrot.slane %v540_v35, 4  ;;  %v533_v40 = vsel %vm532_vm14, %v1296_v36, 0.0  ;;  %v541_v41 = vmul.f32 %v1296_v36, %v1296_v36 }
 0x1a4   : > { %v524_v42 = vpop.f32.mrf.mxu0  ;;  %v534_v43 = vrot.slane %v533_v40, 4  ;;  %v597_v37 = vmul.f32 %v594_v28, %v1296_v36 }
 0x1a5   : > { %v528_v44 = vrot.slane %v527_v38, 2  ;;  %v543_v45 = vadd.f32 %v542_v39, %v540_v35  ;;  %v548_v46 = vsel %vm532_vm14, %v541_v41, 0.0 }
 0x1a6   : > { %v535_v47 = vadd.f32 %v534_v43, %v533_v40  ;;  %v549_v48 = vrot.slane %v548_v46, 4 }
 0x1a7   : > { %v529_v49 = vadd.f32 %v528_v44, %v527_v38  ;;  %v544_v50 = vrot.slane %v543_v45, 2 }
 0x1a8   : > { %v536_v51 = vrot.slane %v535_v47, 2  ;;  %v550_v52 = vadd.f32 %v549_v48, %v548_v46  ;;  %v633_v46 = vsub.s32 1, %v1221_v55 }
 0x1a9   : > { %v530_v53 = vrot.slane %v529_v49, 1  ;;  %v545_v54 = vadd.f32 %v544_v50, %v543_v45 }
 0x1aa   : > { %v537_v57 = vadd.f32 %v536_v51, %v535_v47  ;;  %v551_v59 = vrot.slane %v550_v52, 2  ;;  %v634_v47 = vrot.slane %v1226_v56, %v633_v46 }
 0x1ab   : > { %v531_v60 = vadd.f32 %v530_v53, %v529_v49  ;;  %v546_v63 = vrot.slane %v545_v54, 1 }
 0x1ac   : > { %v538_v61 = vrot.slane %v537_v57, 1  ;;  %v552_v62 = vadd.f32 %v551_v59, %v550_v52 }
 0x1ad   : > { %v555_v0 = vmul.f32 0.125, %v531_v60  ;;  %v547_v5 = vadd.f32 %v546_v63, %v545_v54 }
 0x1ae   : > { %v539_v1 = vadd.f32 %v538_v61, %v537_v57  ;;  %v553_v3 = vrot.slane %v552_v62, 1 }
 0x1af   : > { %v557_v2 = vmul.f32 8.0, %v555_v0  ;;  %v565_v8 = vsub.f32 %v1291_v32, %v555_v0 }
 0x1b0   : > { %v556_v4 = vmul.f32 0.125, %v539_v1  ;;  %v554_v11 = vadd.f32 %v553_v3, %v552_v62 }
 0x1b1   : > { %v559_v7 = vmul.f32 %v557_v2, %v555_v0 }
 0x1b2   : > { %v558_v9 = vmul.f32 8.0, %v556_v4  ;;  %v566_v17 = vsub.f32 %v1296_v36, %v556_v4 }
 0x1b3   : > { %v561_v10 = vsub.f32 %v547_v5, %v559_v7 }
 0x1b4   : > { %v560_v12 = vmul.f32 %v558_v9, %v556_v4 }
 0x1b5   : > { %v563_v13 = vmul.f32 0.14285715, %v561_v10 }
 0x1b6   : > { %v562_v14 = vsub.f32 %v554_v11, %v560_v12 }
 0x1b7   : > { %1010 = vrsqrt.f32 %v563_v13 }
 0x1b8   : > { %v564_v6 = vmul.f32 0.14285715, %v562_v14 }
 0x1ba   : > { %1012 = vrsqrt.f32 %v564_v6 }
 0x1c4   : > { %v1011_v15 = vpop.eup %1010 }
 0x1c5   : > { %v569_v16 = vmul.f32 %v1011_v15, %v565_v8 }
 0x1c7   : > { %v1013_v18 = vpop.eup %1012  ;;  %v571_v19 = vadd.f32 1e-08, %v569_v16 }
 0x1c8   : > { %v570_v20 = vmul.f32 %v1013_v18, %v566_v17  ;;  %v799_v18 = vsub.s32 2, %v1221_v55 }
 0x1c9   : > { %v911_v21 = vmul.f32 -1.442695, %v571_v19 }
 0x1ca   : > { %v572_v22 = vadd.f32 1e-08, %v570_v20 }
 0x1cb   : > { %1014 = vpow2.f32 %v911_v21 }
 0x1cc   : > { %v912_v23 = vmul.f32 -1.442695, %v572_v22 }
 0x1ce   : > { %1016 = vpow2.f32 %v912_v23 }
 0x1d3   : > { %s935_s13 = spop %934 }
 0x1d4   : > { %v791_v17 = vstv %s935_s13 }
 0x1d8   : > { %v1015_v24 = vpop.eup %1014 }
 0x1d9   : > { %v579_v25 = vadd.f32 1.0, %v1015_v24  ;;  %v800_v24 = vrot.slane %v1226_v56, %v799_v18 }
 0x1db   : > { %v1017_v26 = vpop.eup %1016  ;;  %1018 = vrcp.f32 %v579_v25 }
 0x1dc   : > { %v580_v27 = vadd.f32 1.0, %v1017_v26 }
 0x1de   : > { %1020 = vrcp.f32 %v580_v27 }
 0x1e8   : > { %v1019_v29 = vpop.eup %1018 }
 0x1e9   : > { %v598_v33 = vsub.f32 1.0, %v1019_v29  ;;  %v585_v39 = vmul.f32 %v1019_v29, %v1291_v32 }
 0x1eb   : > { %v1021_v34 = vpop.eup %1020  ;;  %v600_v35 = vmul.f32 %v598_v33, %v596_v31 }
 0x1ec   : > { %v599_v38 = vsub.f32 1.0, %v1021_v34  ;;  %v586_v40 = vmul.f32 %v1021_v34, %v1296_v36 }
 0x1ed   : > { %v602_v42 = vadd.f32 %v600_v35, %v585_v39 }
 0x1ee   : > { %v601_v41 = vmul.f32 %v599_v38, %v597_v37 }
 0x1ef   : > { %v604_v45 = vpack.c.bf16 %v602_v42, %v602_v42 }
 0x1f0   : > { %v603_v43 = vadd.f32 %v601_v41, %v586_v40 }
 0x1f2   : > { %v605_v44 = vpack.c.bf16 %v603_v43, %v603_v43 }
 0x1f4   : > { %926 = vmatprep.mubr.msk.bf16.mxu1 %vm532_vm14, %v605_v44 }
 0x1f5   : > { %749 = vmatmul.mubr.bf16.vlgmr.msra.gmra.mxu1 %v604_v45 }
 0x2b5   : > { %v750_v48 = vpop.f32.mrf.mxu1 }
 0x2b6   : > { %v751_v49 = vadd.f32 %v750_v48, %v634_v47 }
 0x2b7   : > { %v752_v50 = vpop.f32.mrf.mxu1 }
 0x2b8   : > { %v764_v51 = vmul.f32 %v751_v49, %v751_v49  ;;  %v757_v32 = vsel %vm756_vm15, %v751_v49, 0.0  ;;  %v793_v20 = vmul.f32 %v791_v17, %v751_v49 }
 0x2b9   : > { %v758_v36 = vrot.slane %v757_v32, 4  ;;  %v753_v52 = vpop.f32.mrf.mxu1 }
 0x2ba   : > { %v765_v53 = vsel %vm756_vm15, %v764_v51, 0.0 }
 0x2bb   : > { %v759_v54 = vadd.f32 %v758_v36, %v757_v32  ;;  %v766_v57 = vrot.slane %v765_v53, 4  ;;  %v754_v59 = vpop.f32.mrf.mxu1 }
 0x2bd   : > { %v760_v60 = vrot.slane %v759_v54, 2  ;;  %v767_v61 = vadd.f32 %v766_v57, %v765_v53 }
 0x2bf   : > { %v761_v62 = vadd.f32 %v760_v60, %v759_v54  ;;  %v768_v63 = vrot.slane %v767_v61, 2 }
 0x2c1   : > { %v762_v0 = vrot.slane %v761_v62, 1  ;;  %v769_v1 = vadd.f32 %v768_v63, %v767_v61 }
 0x2c3   : > { %v763_v2 = vadd.f32 %v762_v0, %v761_v62  ;;  %v770_v3 = vrot.slane %v769_v1, 1 }
 0x2c5   : > { %v772_v4 = vmul.f32 0.125, %v763_v2  ;;  %v771_v7 = vadd.f32 %v770_v3, %v769_v1 }
 0x2c7   : > { %v773_v5 = vmul.f32 8.0, %v772_v4  ;;  %v777_v12 = vsub.f32 %v751_v49, %v772_v4 }
 0x2c9   : > { %v774_v9 = vmul.f32 %v773_v5, %v772_v4 }
 0x2cb   : > { %v775_v10 = vsub.f32 %v771_v7, %v774_v9 }
 0x2cd   : > { %v776_v11 = vmul.f32 0.14285715, %v775_v10 }
 0x2cf   : > { %1022 = vrsqrt.f32 %v776_v11 }
 0x2dc   : > { %v1023_v13 = vpop.eup %1022 }
 0x2dd   : > { %v779_v14 = vmul.f32 %v1023_v13, %v777_v12 }
 0x2df   : > { %v780_v6 = vadd.f32 1e-08, %v779_v14 }
 0x2e1   : > { %v927_v8 = vmul.f32 -1.442695, %v780_v6 }
 0x2e3   : > { %1024 = vpow2.f32 %v927_v8 }
 0x2f0   : > { %v1025_v15 = vpop.eup %1024 }
 0x2f1   : > { %v784_v16 = vadd.f32 1.0, %v1025_v15 }
 0x2f3   : > { %1026 = vrcp.f32 %v784_v16 }
 0x300   : > { %v1027_v19 = vpop.eup %1026 }
 0x301   : > { %v794_v21 = vsub.f32 1.0, %v1027_v19  ;;  %v787_v23 = vmul.f32 %v1027_v19, %v751_v49 }
 0x303   : > { %v795_v22 = vmul.f32 %v794_v21, %v793_v20 }
 0x305   : > { %v796_v25 = vadd.f32 %v795_v22, %v787_v23 }
 0x307   : > { %v801_v26 = vmul.f32 %v800_v24, %v796_v25 }
 0x309   : > { %v802_v27 = vsel %vm756_vm15, %v801_v26, 0.0 }
 0x30a   : > { %803 = vadd.xlane.f32.xlu1 %v802_v27 }
 0x393   : > { %v804_v28 = vpop.xlane.xlu1 %803 }
 0x394   : > { %v809_v29 = vadd.f32 %v804_v28, %v1230_v58 }
 0x396   : > { %v928_v30 = vmul.f32 -1.442695, %v809_v29 }
 0x398   : > { %1028 = vpow2.f32 %v928_v30 }
 0x3a5   : > { %v1029_v31 = vpop.eup %1028 }
 0x3a6   : > { %v813_v55 = vadd.f32 1.0, %v1029_v31 }
 0x3a8   : > { %1030 = vrcp.f32 %v813_v55 }
 0x3b5   : > { %v1031_v56 = vpop.eup %1030 }
 0x3b6   : > { %817 = vst.msk [vmem:[%s195_s19] sm:$0xff] %vm816_vm0, %v1031_v56 }
 0x3b7 PF: > { %s14_s15 = sadd.s32 1, %s1038_s15  }
 0x3b8   : > { %p11_p4 = scmp.ge.s32.totalorder %s14_s15, 6  }
 0x3ba   :  { %13 = sbr.rel (!%p11_p4) target bundleno = 1 (0x1), region = 66 }

</bundles_post_ra>
